<compile_context>
chip_gen: v6e
topology: v6e:2x2x1
jax: 0.10.0
libtpu: 0.0.40
codegen_flags: <defaults>
</compile_context>

<pallas_src>
import functools
import numpy as np
import jax
import jax.numpy as jnp
from jax import lax
from jax.experimental import pallas as pl
from jax.experimental.pallas import tpu as pltpu


# ------------------------------ Pallas kernel --------------------------------

def attention_kernel(*refs, num_head, dim, v_dim, inv_temp, use_merge, v_proj):
    if use_merge:
        (lens_ref, dec_ref, feat_ref, wq_ref, bq_ref, wkv_ref, bkv_ref,
         wm_ref, bm_ref, attn_ref, ctx_ref) = refs
    else:
        (lens_ref, dec_ref, feat_ref, wq_ref, bq_ref, wkv_ref, bkv_ref,
         attn_ref, ctx_ref) = refs
        wm_ref = bm_ref = None

    b = pl.program_id(0)
    ts = feat_ref.shape[1]

    dec = dec_ref[0]                       # (1, q_dim)
    feat = feat_ref[0]                     # (ts, v_dim)

    # Query projection: (1, q_dim) @ (q_dim, nh*dim)
    q_all = jnp.tanh(
        jnp.dot(dec, wq_ref[...], preferred_element_type=jnp.float32) + bq_ref[...])

    # Fused key/value projection: one MXU matmul -> (ts, nh*dim [+ nh*v_dim])
    kv = jnp.tanh(
        jnp.dot(feat, wkv_ref[...], preferred_element_type=jnp.float32) + bkv_ref[...])

    length = lens_ref[b]                   # scalar from SMEM
    t_idx = lax.broadcasted_iota(jnp.int32, (1, ts), 1)
    valid = t_idx < length

    attn_rows = []
    ctx_rows = []
    for h in range(num_head):              # static unroll over heads
        qh = q_all[:, h * dim:(h + 1) * dim]            # (1, dim)
        kh = kv[:, h * dim:(h + 1) * dim]               # (ts, dim)
        if v_proj:
            off = num_head * dim + h * v_dim
            vh = kv[:, off:off + v_dim]                 # (ts, v_dim)
        else:
            vh = feat                                   # value = enc_feat

        # energy_h = q_h . k_h / temperature  -> (1, ts)
        e = lax.dot_general(qh, kh, (((1,), (1,)), ((), ())),
                            preferred_element_type=jnp.float32) * inv_temp
        e = jnp.where(valid, e, jnp.float32(-1e30))     # masked_fill(-inf)
        m = jnp.max(e, axis=-1, keepdims=True)
        p = jnp.exp(e - m)
        a = p / jnp.sum(p, axis=-1, keepdims=True)      # exact softmax
        attn_rows.append(a)
        ctx_rows.append(jnp.dot(a, vh, preferred_element_type=jnp.float32))  # (1, v_dim)

    attn_ref[...] = jnp.concatenate(attn_rows, axis=0)[None, :, :]   # (1, nh, ts)

    if use_merge:
        ctx_cat = jnp.concatenate(ctx_rows, axis=1)                  # (1, nh*v_dim)
        ctx = (jnp.dot(ctx_cat, wm_ref[...], preferred_element_type=jnp.float32)
               + bm_ref[...])
    else:
        ctx = ctx_rows[0]
    ctx_ref[...] = ctx[None, :, :]                                   # (1, 1, v_dim)


# --------------------------------- wrapper ------------------------------------

class AttentionPallas:
    """Pallas port of Attention(v_dim, q_dim, 'dot', dim, num_head, temperature,
    v_proj, loc_kernel_size, loc_kernel_num) — ScaleDotAttention path only."""

    def __init__(self, v_dim, q_dim, mode, dim, num_head, temperature,
                 v_proj, loc_kernel_size, loc_kernel_num, key):
        assert mode.lower() == 'dot', "only mode='dot' is implemented"
        # TODO(synk): mode='loc' (LocationAwareAttention: Conv1d over previous
        # attention + location projection) is not implemented.
        self.v_dim = v_dim
        self.q_dim = q_dim
        self.dim = dim
        self.num_head = num_head
        self.temperature = float(temperature)
        self.v_proj = bool(v_proj)

        nh = num_head
        ks = jax.random.split(key, 8)
        s = 0.1
        self.Wq = (s * jax.random.normal(ks[0], (nh * dim, q_dim))).astype(jnp.float32)
        self.bq = (s * jax.random.normal(ks[1], (nh * dim,))).astype(jnp.float32)
        self.Wk = (s * jax.random.normal(ks[2], (nh * dim, v_dim))).astype(jnp.float32)
        self.bk = (s * jax.random.normal(ks[3], (nh * dim,))).astype(jnp.float32)
        if self.v_proj:
            self.Wv = (s * jax.random.normal(ks[4], (nh * v_dim, v_dim))).astype(jnp.float32)
            self.bv = (s * jax.random.normal(ks[5], (nh * v_dim,))).astype(jnp.float32)
        if nh > 1:
            self.Wm = (s * jax.random.normal(ks[6], (v_dim, nh * v_dim))).astype(jnp.float32)
            self.bm = (s * jax.random.normal(ks[7], (v_dim,))).astype(jnp.float32)

        # Pre-transposed / fused kernel-side weights (built once, not per forward).
        self.WqT = self.Wq.T                                   # (q_dim, nh*dim)
        self.bq_row = self.bq.reshape(1, -1)
        if self.v_proj:
            self.WkvT = jnp.concatenate([self.Wk.T, self.Wv.T], axis=1)
            self.bkv_row = jnp.concatenate([self.bk, self.bv]).reshape(1, -1)
        else:
            self.WkvT = self.Wk.T
            self.bkv_row = self.bk.reshape(1, -1)
        if nh > 1:
            self.WmT = self.Wm.T                               # (nh*v_dim, v_dim)
            self.bm_row = self.bm.reshape(1, -1)

    def forward(self, dec_state, enc_feat, enc_len):
        bs, ts, v_dim = enc_feat.shape
        nh, dim, q_dim = self.num_head, self.dim, self.q_dim
        lens = jnp.asarray(np.asarray(enc_len, dtype=np.int32))
        dec3 = dec_state.reshape(bs, 1, q_dim)
        kv_w = self.WkvT.shape[1]

        kernel = functools.partial(
            attention_kernel, num_head=nh, dim=dim, v_dim=self.v_dim,
            inv_temp=1.0 / self.temperature, use_merge=(nh > 1), v_proj=self.v_proj)

        in_specs = [
            pl.BlockSpec((1, 1, q_dim), lambda b, l: (b, 0, 0)),      # dec_state
            pl.BlockSpec((1, ts, v_dim), lambda b, l: (b, 0, 0)),     # enc_feat
            pl.BlockSpec((q_dim, nh * dim), lambda b, l: (0, 0)),     # Wq^T
            pl.BlockSpec((1, nh * dim), lambda b, l: (0, 0)),         # bq
            pl.BlockSpec((v_dim, kv_w), lambda b, l: (0, 0)),         # [Wk^T | Wv^T]
            pl.BlockSpec((1, kv_w), lambda b, l: (0, 0)),             # [bk | bv]
        ]
        args = [lens, dec3, enc_feat, self.WqT, self.bq_row, self.WkvT, self.bkv_row]
        if nh > 1:
            in_specs += [pl.BlockSpec((nh * self.v_dim, self.v_dim), lambda b, l: (0, 0)),
                         pl.BlockSpec((1, self.v_dim), lambda b, l: (0, 0))]
            args += [self.WmT, self.bm_row]

        out_specs = (pl.BlockSpec((1, nh, ts), lambda b, l: (b, 0, 0)),
                     pl.BlockSpec((1, 1, self.v_dim), lambda b, l: (b, 0, 0)))
        out_shape = (jax.ShapeDtypeStruct((bs, nh, ts), jnp.float32),
                     jax.ShapeDtypeStruct((bs, 1, self.v_dim), jnp.float32))

        attn, ctx3 = pl.pallas_call(
            kernel,
            out_shape=out_shape,
            grid_spec=pltpu.PrefetchScalarGridSpec(
                num_scalar_prefetch=1, grid=(bs,),
                in_specs=in_specs, out_specs=out_specs),
            compiler_params=pltpu.CompilerParams(
                dimension_semantics=("parallel",)),
        )(*args)

        return attn, ctx3[:, 0, :]


# --------------------------- pure-numpy reference -----------------------------

def _softmax(x, axis=-1):
    m = np.max(x, axis=axis, keepdims=True)
    e = np.exp(x - m)
    return e / np.sum(e, axis=axis, keepdims=True)


def ref_forward(dec_state, enc_feat, enc_len, mod):
    bs, ts, _ = enc_feat.shape
    nh, dim, v_dim = mod.num_head, mod.dim, mod.v_dim
    Wq, bq = np.asarray(mod.Wq), np.asarray(mod.bq)
    Wk, bk = np.asarray(mod.Wk), np.asarray(mod.bk)

    query = np.tanh(dec_state @ Wq.T + bq)                        # (bs, nh*dim)
    q = query.reshape(bs * nh, dim)
    key = np.tanh(enc_feat @ Wk.T + bk)                           # (bs, ts, nh*dim)
    if mod.v_proj:
        Wv, bv = np.asarray(mod.Wv), np.asarray(mod.bv)
        value = np.tanh(enc_feat @ Wv.T + bv)                     # (bs, ts, nh*v_dim)
    else:
        value = enc_feat
    if nh > 1:
        key = key.reshape(bs, ts, nh, dim).transpose(0, 2, 1, 3).reshape(bs * nh, ts, dim)
        if mod.v_proj:
            value = value.reshape(bs, ts, nh, v_dim).transpose(0, 2, 1, 3).reshape(bs * nh, ts, v_dim)
        else:
            value = np.concatenate([value] * nh, axis=0)

    mask = np.zeros((bs, nh, ts), dtype=bool)
    for idx, sl in enumerate(np.asarray(enc_len)):
        mask[idx, :, int(sl):] = True
    mask = mask.reshape(bs * nh, ts)

    energy = np.einsum('id,itd->it', q, key)
    attn = energy / mod.temperature
    attn = np.where(mask, -np.inf, attn)
    attn = _softmax(attn, axis=-1)
    output = np.einsum('it,itd->id', attn, value)                 # (bs*nh, v_dim)
    attn = attn.reshape(bs, nh, ts)
    if nh > 1:
        Wm, bm = np.asarray(mod.Wm), np.asarray(mod.bm)
        context = output.reshape(bs, nh * v_dim) @ Wm.T + bm
    else:
        context = output
    return attn, context


# ----------------------------------- main --------------------------------------

if __name__ == "__main__":
    bs, ts = 2, 16
    v_dim, q_dim, dim, num_head = 32, 64, 32, 2
    temperature = 0.5

    key = jax.random.PRNGKey(0)
    k_model, k_dec, k_feat = jax.random.split(key, 3)

    att = AttentionPallas(v_dim=v_dim, q_dim=q_dim, mode='dot', dim=dim,
                          num_head=num_head, temperature=temperature, v_proj=True,
                          loc_kernel_size=3, loc_kernel_num=8, key=k_model)

    dec_state = jax.random.normal(k_dec, (bs, q_dim), dtype=jnp.float32)
    enc_feat = jax.random.normal(k_feat, (bs, ts, v_dim), dtype=jnp.float32)
    enc_len = np.array([16, 11], dtype=np.int32)

    attn, context = att.forward(dec_state, enc_feat, enc_len)
    attn = jax.block_until_ready(attn)
    context = jax.block_until_ready(context)

    ref_attn, ref_ctx = ref_forward(np.asarray(dec_state), np.asarray(enc_feat),
                                    enc_len, att)

    np.testing.assert_allclose(np.asarray(attn), ref_attn, rtol=1e-3, atol=1e-4)
    np.testing.assert_allclose(np.asarray(context), ref_ctx, rtol=1e-3, atol=1e-4)

    print("KERNEL_OK")
</pallas_src>

<mosaic_0001>
module attributes {stable_mosaic.version = 11 : i64} {
  func.func @attention_kernel(%arg0: i32, %arg1: memref<2xi32, #tpu.memory_space<smem>>, %arg2: memref<1x1x64xf32, #tpu.memory_space<vmem>>, %arg3: memref<1x16x32xf32, #tpu.memory_space<vmem>>, %arg4: memref<64x64xf32, #tpu.memory_space<vmem>>, %arg5: memref<1x64xf32, #tpu.memory_space<vmem>>, %arg6: memref<32x128xf32, #tpu.memory_space<vmem>>, %arg7: memref<1x128xf32, #tpu.memory_space<vmem>>, %arg8: memref<64x32xf32, #tpu.memory_space<vmem>>, %arg9: memref<1x32xf32, #tpu.memory_space<vmem>>, %arg10: memref<1x2x16xf32, #tpu.memory_space<vmem>>, %arg11: memref<1x1x32xf32, #tpu.memory_space<vmem>>) attributes {dimension_semantics = [#tpu.dimension_semantics<parallel>], iteration_bounds = array<i64: 2>, scalar_prefetch = 1 : i64, scratch_operands = 0 : i64, tpu.core_type = #tpu.core_type<tc>, window_params = [{transform_indices = @transform_0, window_bounds = array<i64: 1, 1, 64>}, {transform_indices = @transform_1, window_bounds = array<i64: 1, 16, 32>}, {pipeline_mode = #tpu.pipeline_mode<synchronous>, transform_indices = @transform_2, window_bounds = array<i64: 64, 64>}, {pipeline_mode = #tpu.pipeline_mode<synchronous>, transform_indices = @transform_3, window_bounds = array<i64: 1, 64>}, {pipeline_mode = #tpu.pipeline_mode<synchronous>, transform_indices = @transform_4, window_bounds = array<i64: 32, 128>}, {pipeline_mode = #tpu.pipeline_mode<synchronous>, transform_indices = @transform_5, window_bounds = array<i64: 1, 128>}, {pipeline_mode = #tpu.pipeline_mode<synchronous>, transform_indices = @transform_6, window_bounds = array<i64: 64, 32>}, {pipeline_mode = #tpu.pipeline_mode<synchronous>, transform_indices = @transform_7, window_bounds = array<i64: 1, 32>}, {transform_indices = @transform_8, window_bounds = array<i64: 1, 2, 16>}, {transform_indices = @transform_9, window_bounds = array<i64: 1, 1, 32>}]} {
    %c0 = arith.constant 0 : index
    %c0_0 = arith.constant 0 : index
    %c0_1 = arith.constant 0 : index
    %0 = vector.load %arg2[%c0, %c0_0, %c0_1] : memref<1x1x64xf32, #tpu.memory_space<vmem>>, vector<1x1x64xf32>
    %1 = vector.shape_cast %0 : vector<1x1x64xf32> to vector<1x64xf32>
    %c0_2 = arith.constant 0 : index
    %c0_3 = arith.constant 0 : index
    %c0_4 = arith.constant 0 : index
    %2 = vector.load %arg3[%c0_2, %c0_3, %c0_4] : memref<1x16x32xf32, #tpu.memory_space<vmem>>, vector<1x16x32xf32>
    %3 = vector.shape_cast %2 : vector<1x16x32xf32> to vector<16x32xf32>
    %c0_5 = arith.constant 0 : index
    %c0_6 = arith.constant 0 : index
    %4 = vector.load %arg4[%c0_5, %c0_6] : memref<64x64xf32, #tpu.memory_space<vmem>>, vector<64x64xf32>
    %cst = arith.constant dense<0.000000e+00> : vector<1x64xf32>
    %5 = tpu.matmul %1, %4, %cst {dimension_numbers = #tpu.dot_dimension_numbers<[1], [0], [0], [1], [0, 0, 1, 1], [], []>} : vector<1x64xf32>, vector<64x64xf32>, vector<1x64xf32> -> vector<1x64xf32>
    %c0_7 = arith.constant 0 : index
    %c0_8 = arith.constant 0 : index
    %6 = vector.load %arg5[%c0_7, %c0_8] : memref<1x64xf32, #tpu.memory_space<vmem>>, vector<1x64xf32>
    %7 = arith.addf %5, %6 : vector<1x64xf32>
    %8 = math.tanh %7 : vector<1x64xf32>
    %c0_9 = arith.constant 0 : index
    %c0_10 = arith.constant 0 : index
    %9 = vector.load %arg6[%c0_9, %c0_10] : memref<32x128xf32, #tpu.memory_space<vmem>>, vector<32x128xf32>
    %cst_11 = arith.constant dense<0.000000e+00> : vector<16x128xf32>
    %10 = tpu.matmul %3, %9, %cst_11 {dimension_numbers = #tpu.dot_dimension_numbers<[1], [0], [0], [1], [0, 0, 1, 1], [], []>} : vector<16x32xf32>, vector<32x128xf32>, vector<16x128xf32> -> vector<16x128xf32>
    %c0_12 = arith.constant 0 : index
    %c0_13 = arith.constant 0 : index
    %11 = vector.load %arg7[%c0_12, %c0_13] : memref<1x128xf32, #tpu.memory_space<vmem>>, vector<1x128xf32>
    %12 = vector.broadcast %11 : vector<1x128xf32> to vector<16x128xf32>
    %13 = arith.addf %10, %12 : vector<16x128xf32>
    %14 = math.tanh %13 : vector<16x128xf32>
    %15 = arith.index_cast %arg0 : i32 to index
    %16 = memref.load %arg1[%15] : memref<2xi32, #tpu.memory_space<smem>>
    %17 = tpu.iota {dimensions = array<i32: 1>} : vector<1x16xi32>
    %18 = vector.broadcast %16 : i32 to vector<1x16xi32>
    %19 = arith.cmpi slt, %17, %18 : vector<1x16xi32>
    %20 = vector.extract_strided_slice %8 {offsets = [0, 0], sizes = [1, 32], strides = [1, 1]} : vector<1x64xf32> to vector<1x32xf32>
    %21 = vector.extract_strided_slice %14 {offsets = [0, 0], sizes = [16, 32], strides = [1, 1]} : vector<16x128xf32> to vector<16x32xf32>
    %22 = vector.extract_strided_slice %14 {offsets = [0, 64], sizes = [16, 32], strides = [1, 1]} : vector<16x128xf32> to vector<16x32xf32>
    %cst_14 = arith.constant dense<0.000000e+00> : vector<1x16xf32>
    %23 = tpu.matmul %20, %21, %cst_14 {dimension_numbers = #tpu.dot_dimension_numbers<[1], [1], [0], [0], [0, 0, 1, 0], [], []>} : vector<1x32xf32>, vector<16x32xf32>, vector<1x16xf32> -> vector<1x16xf32>
    %cst_15 = arith.constant 2.000000e+00 : f32
    %24 = vector.broadcast %cst_15 : f32 to vector<1x16xf32>
    %25 = arith.mulf %23, %24 : vector<1x16xf32>
    %cst_16 = arith.constant -1.000000e+30 : f32
    %26 = vector.broadcast %cst_16 : f32 to vector<1x16xf32>
    %27 = arith.select %19, %25, %26 : vector<1x16xi1>, vector<1x16xf32>
    %cst_17 = arith.constant dense<0xFF800000> : vector<1xf32>
    %28 = vector.multi_reduction <maximumf>, %27, %cst_17 [1] : vector<1x16xf32> to vector<1xf32>
    %29 = vector.shape_cast %28 : vector<1xf32> to vector<1x1xf32>
    %30 = vector.broadcast %29 : vector<1x1xf32> to vector<1x16xf32>
    %31 = arith.subf %27, %30 : vector<1x16xf32>
    %32 = math.exp %31 : vector<1x16xf32>
    %cst_18 = arith.constant dense<0.000000e+00> : vector<1xf32>
    %33 = vector.multi_reduction <add>, %32, %cst_18 [1] : vector<1x16xf32> to vector<1xf32>
    %34 = vector.shape_cast %33 : vector<1xf32> to vector<1x1xf32>
    %35 = vector.broadcast %34 : vector<1x1xf32> to vector<1x16xf32>
    %36 = arith.divf %32, %35 : vector<1x16xf32>
    %cst_19 = arith.constant dense<0.000000e+00> : vector<1x32xf32>
    %37 = tpu.matmul %36, %22, %cst_19 {dimension_numbers = #tpu.dot_dimension_numbers<[1], [0], [0], [1], [0, 0, 1, 1], [], []>} : vector<1x16xf32>, vector<16x32xf32>, vector<1x32xf32> -> vector<1x32xf32>
    %38 = vector.extract_strided_slice %8 {offsets = [0, 32], sizes = [1, 32], strides = [1, 1]} : vector<1x64xf32> to vector<1x32xf32>
    %39 = vector.extract_strided_slice %14 {offsets = [0, 32], sizes = [16, 32], strides = [1, 1]} : vector<16x128xf32> to vector<16x32xf32>
    %40 = vector.extract_strided_slice %14 {offsets = [0, 96], sizes = [16, 32], strides = [1, 1]} : vector<16x128xf32> to vector<16x32xf32>
    %cst_20 = arith.constant dense<0.000000e+00> : vector<1x16xf32>
    %41 = tpu.matmul %38, %39, %cst_20 {dimension_numbers = #tpu.dot_dimension_numbers<[1], [1], [0], [0], [0, 0, 1, 0], [], []>} : vector<1x32xf32>, vector<16x32xf32>, vector<1x16xf32> -> vector<1x16xf32>
    %cst_21 = arith.constant 2.000000e+00 : f32
    %42 = vector.broadcast %cst_21 : f32 to vector<1x16xf32>
    %43 = arith.mulf %41, %42 : vector<1x16xf32>
    %cst_22 = arith.constant -1.000000e+30 : f32
    %44 = vector.broadcast %cst_22 : f32 to vector<1x16xf32>
    %45 = arith.select %19, %43, %44 : vector<1x16xi1>, vector<1x16xf32>
    %cst_23 = arith.constant dense<0xFF800000> : vector<1xf32>
    %46 = vector.multi_reduction <maximumf>, %45, %cst_23 [1] : vector<1x16xf32> to vector<1xf32>
    %47 = vector.shape_cast %46 : vector<1xf32> to vector<1x1xf32>
    %48 = vector.broadcast %47 : vector<1x1xf32> to vector<1x16xf32>
    %49 = arith.subf %45, %48 : vector<1x16xf32>
    %50 = math.exp %49 : vector<1x16xf32>
    %cst_24 = arith.constant dense<0.000000e+00> : vector<1xf32>
    %51 = vector.multi_reduction <add>, %50, %cst_24 [1] : vector<1x16xf32> to vector<1xf32>
    %52 = vector.shape_cast %51 : vector<1xf32> to vector<1x1xf32>
    %53 = vector.broadcast %52 : vector<1x1xf32> to vector<1x16xf32>
    %54 = arith.divf %50, %53 : vector<1x16xf32>
    %cst_25 = arith.constant dense<0.000000e+00> : vector<1x32xf32>
    %55 = tpu.matmul %54, %40, %cst_25 {dimension_numbers = #tpu.dot_dimension_numbers<[1], [0], [0], [1], [0, 0, 1, 1], [], []>} : vector<1x16xf32>, vector<16x32xf32>, vector<1x32xf32> -> vector<1x32xf32>
    %56 = tpu.concatenate %36, %54 in 0 : vector<1x16xf32>, vector<1x16xf32> -> vector<2x16xf32>
    %57 = vector.shape_cast %56 : vector<2x16xf32> to vector<1x2x16xf32>
    %c0_26 = arith.constant 0 : index
    %c0_27 = arith.constant 0 : index
    %c0_28 = arith.constant 0 : index
    %58 = vector.load %arg10[%c0_26, %c0_27, %c0_28] : memref<1x2x16xf32, #tpu.memory_space<vmem>>, vector<1x2x16xf32>
    tpu.vector_store %arg10[%c0_26, %c0_27, %c0_28], %57 {strides = array<i32>} : memref<1x2x16xf32, #tpu.memory_space<vmem>>, vector<1x2x16xf32>,
    %59 = tpu.concatenate %37, %55 in 1 : vector<1x32xf32>, vector<1x32xf32> -> vector<1x64xf32>
    %c0_29 = arith.constant 0 : index
    %c0_30 = arith.constant 0 : index
    %60 = vector.load %arg8[%c0_29, %c0_30] : memref<64x32xf32, #tpu.memory_space<vmem>>, vector<64x32xf32>
    %cst_31 = arith.constant dense<0.000000e+00> : vector<1x32xf32>
    %61 = tpu.matmul %59, %60, %cst_31 {dimension_numbers = #tpu.dot_dimension_numbers<[1], [0], [0], [1], [0, 0, 1, 1], [], []>} : vector<1x64xf32>, vector<64x32xf32>, vector<1x32xf32> -> vector<1x32xf32>
    %c0_32 = arith.constant 0 : index
    %c0_33 = arith.constant 0 : index
    %62 = vector.load %arg9[%c0_32, %c0_33] : memref<1x32xf32, #tpu.memory_space<vmem>>, vector<1x32xf32>
    %63 = arith.addf %61, %62 : vector<1x32xf32>
    %64 = vector.shape_cast %63 : vector<1x32xf32> to vector<1x1x32xf32>
    %c0_34 = arith.constant 0 : index
    %c0_35 = arith.constant 0 : index
    %c0_36 = arith.constant 0 : index
    %65 = vector.load %arg11[%c0_34, %c0_35, %c0_36] : memref<1x1x32xf32, #tpu.memory_space<vmem>>, vector<1x1x32xf32>
    tpu.vector_store %arg11[%c0_34, %c0_35, %c0_36], %64 {strides = array<i32>} : memref<1x1x32xf32, #tpu.memory_space<vmem>>, vector<1x1x32xf32>,
    return
  }
  func.func @transform_0(%arg0: i32, %arg1: memref<2xi32, #tpu.memory_space<smem>>) -> (i32, i32, i32) {
    %c0_i32 = arith.constant 0 : i32
    %c0_i32_0 = arith.constant 0 : i32
    %c0_i32_1 = arith.constant 0 : i32
    return %arg0, %c0_i32, %c0_i32_0 : i32, i32, i32
  }
  func.func @transform_1(%arg0: i32, %arg1: memref<2xi32, #tpu.memory_space<smem>>) -> (i32, i32, i32) {
    %c0_i32 = arith.constant 0 : i32
    %c0_i32_0 = arith.constant 0 : i32
    %c0_i32_1 = arith.constant 0 : i32
    return %arg0, %c0_i32, %c0_i32_0 : i32, i32, i32
  }
  func.func @transform_2(%arg0: i32, %arg1: memref<2xi32, #tpu.memory_space<smem>>) -> (i32, i32) {
    %c0_i32 = arith.constant 0 : i32
    %c0_i32_0 = arith.constant 0 : i32
    %c0_i32_1 = arith.constant 0 : i32
    return %c0_i32, %c0_i32_0 : i32, i32
  }
  func.func @transform_3(%arg0: i32, %arg1: memref<2xi32, #tpu.memory_space<smem>>) -> (i32, i32) {
    %c0_i32 = arith.constant 0 : i32
    %c0_i32_0 = arith.constant 0 : i32
    %c0_i32_1 = arith.constant 0 : i32
    return %c0_i32, %c0_i32_0 : i32, i32
  }
  func.func @transform_4(%arg0: i32, %arg1: memref<2xi32, #tpu.memory_space<smem>>) -> (i32, i32) {
    %c0_i32 = arith.constant 0 : i32
    %c0_i32_0 = arith.constant 0 : i32
    %c0_i32_1 = arith.constant 0 : i32
    return %c0_i32, %c0_i32_0 : i32, i32
  }
  func.func @transform_5(%arg0: i32, %arg1: memref<2xi32, #tpu.memory_space<smem>>) -> (i32, i32) {
    %c0_i32 = arith.constant 0 : i32
    %c0_i32_0 = arith.constant 0 : i32
    %c0_i32_1 = arith.constant 0 : i32
    return %c0_i32, %c0_i32_0 : i32, i32
  }
  func.func @transform_6(%arg0: i32, %arg1: memref<2xi32, #tpu.memory_space<smem>>) -> (i32, i32) {
    %c0_i32 = arith.constant 0 : i32
    %c0_i32_0 = arith.constant 0 : i32
    %c0_i32_1 = arith.constant 0 : i32
    return %c0_i32, %c0_i32_0 : i32, i32
  }
  func.func @transform_7(%arg0: i32, %arg1: memref<2xi32, #tpu.memory_space<smem>>) -> (i32, i32) {
    %c0_i32 = arith.constant 0 : i32
    %c0_i32_0 = arith.constant 0 : i32
    %c0_i32_1 = arith.constant 0 : i32
    return %c0_i32, %c0_i32_0 : i32, i32
  }
  func.func @transform_8(%arg0: i32, %arg1: memref<2xi32, #tpu.memory_space<smem>>) -> (i32, i32, i32) {
    %c0_i32 = arith.constant 0 : i32
    %c0_i32_0 = arith.constant 0 : i32
    %c0_i32_1 = arith.constant 0 : i32
    return %arg0, %c0_i32, %c0_i32_0 : i32, i32, i32
  }
  func.func @transform_9(%arg0: i32, %arg1: memref<2xi32, #tpu.memory_space<smem>>) -> (i32, i32, i32) {
    %c0_i32 = arith.constant 0 : i32
    %c0_i32_0 = arith.constant 0 : i32
    %c0_i32_1 = arith.constant 0 : i32
    return %arg0, %c0_i32, %c0_i32_0 : i32, i32, i32
  }
}

</mosaic_0001>

<bundles_post_ra>
// kernel: tpu_custom_call.1
= control target key start
LH: loop header
LB: loop body
LE: loop exit
PB: predicated region body
PF: predicated region fallthrough
CT: control target
= control target key end

     0   :  { %s1849_s0 = inlined_call_operand.vmem [shape: s32[2], index: 0, kind: input, shape index: {}]   ;;  %s1850_s1 = inlined_call_operand.vmem [shape: f32[2,1,64], index: 1, kind: input, shape index: {}]   ;;  %s1851_s2 = inlined_call_operand.vmem [shape: f32[2,16,32], index: 2, kind: input, shape index: {}]   ;;  %s1852_s3 = inlined_call_operand.vmem [shape: f32[64,64], index: 3, kind: input, shape index: {}]   ;;  %s1853_s4 = inlined_call_operand.vmem [shape: f32[1,64], index: 4, kind: input, shape index: {}]   ;;  %s1854_s5 = inlined_call_operand.hbm [shape: f32[32,128], index: 5, kind: input, shape index: {}]   ;;  %s1855_s6 = inlined_call_operand.vmem [shape: f32[1,128], index: 6, kind: input, shape index: {}]   ;;  %s1856_s7 = inlined_call_operand.vmem [shape: f32[64,32], index: 7, kind: input, shape index: {}]   ;;  %s1857_s8 = inlined_call_operand.vmem [shape: f32[1,32], index: 8, kind: input, shape index: {}]   ;;  %s1858_s9 = inlined_call_operand.hbm [shape: f32[2,2,16], index: 9, kind: output, shape index: {0}]   ;;  %s1859_s10 = inlined_call_operand.hbm [shape: f32[2,1,32], index: 10, kind: output, shape index: {1}]  }
   0x1   :  { %1860 = sst [smem:[#allocation14_spill]] %s1850_s1  ;;  %s16_s15 = sshll.u32 %s1849_s0, 4  ;;  %s17_s15 = int_to_ptr.vmem [resolvable:$true] %s16_s15 }
   0x2   :  { %1861 = sst [smem:[#allocation15_spill]] %s1851_s2  ;;  %s1363_s16 = scalar_lea.vmem %s17_s15, 16 }
   0x3   :  { %p1364_p0 = scmp.ne.s32.totalorder %s17_s15, %s1363_s16  ;;  %p1368_p1 = scmp.lt.s32.totalorder %s17_s15, %s17_s15 }
   0x4   :  { %p1369_p2 = scmp.lt.s32.totalorder %s1363_s16, %s1363_s16 }
   0x6   :  { %p1370_p3 = por %p1369_p2, %p1368_p1 }
   0x8   :  { %p1371_p4 = pnand %p1370_p3, %p1364_p0 }
   0xa   :  { %1374 = shalt.err (!%p1371_p4)  }
   0xb   :  { %s1499_s17 = smov [#allocation3]  }
   0xc   :  { %19 = dma.vmem_to_smem %s17_s15, 16, %s1499_s17, [#allocation2] }
   0xd   :  { %1469 = dma.done.wait [#allocation2], 16 }
   0xe   :  { %1470 = vsyncadd [#allocation2], 4294967280 }
   0xf   :  { %21 = sfence }
  0x10   :  { %22 = vsyncpa [#allocation5], 0 }
  0x11   :  { %23 = vsyncpa [#allocation6], 0 }
  0x12   :  { %25 = vsyncpa [#allocation6 + $0x1], 0 }
  0x13   :  { %26 = vsyncpa [#allocation9], 0 }
  0x14   :  { %28 = vsyncpa [#allocation9 + $0x1], 0  ;;  %s1568_s18 = smov 0   ;;  %s1570_s0 = smov 0  }
  0x15   :  { %s1572_s19 = smov 0   ;;  %s1574_s20 = smov 0  }
  0x16 LB: > { %s1589_s21 = sadd.s32 4294967295, %s1497_s20   ;;  %s1145_s22 = sadd.s32 4294967294, %s1497_s20   ;;  %s1497_s20 = sphi %s1574_s20, %s1873_s20   ;;  %s1493_s19 = sphi %s1572_s19, %s1872_s19   ;;  %s1489_s0 = sphi %s1570_s0, %s1871_s0   ;;  %s1485_s18 = sphi %s1568_s18, %s1870_s18  }
  0x17   : > { %s1593_s23 = sadd.s32 1, %s1497_s20   ;;  %s219_s24 = sadd.s32 1, %s1493_s19 }
  0x18   : > { %s216_s25 = ssub.s32 %s1497_s20, %s1593_s23  ;;  %p229_p5 = scmp.ne.s32.totalorder %s1493_s19, %s1489_s0 }
  0x19   : > { %p217_p6 = scmp.eq.s32.totalorder %s216_s25, 0  ;;  %p230_p7 = scmp.eq.s32.totalorder %s1589_s21, 1 }
  0x1a   : > { %p235_p8 = scmp.ne.s32.totalorder %s1489_s0, %s1485_s18  ;;  %p236_p9 = scmp.eq.s32.totalorder %s1145_s22, 1 }
  0x1b   : > { %s1604_s26 = scalar_select %p217_p6, %s1493_s19, %s219_s24  }
  0x1c   : > { %p1606_p10 = por %p230_p7, %p229_p5  ;;  %p1610_p11 = por %p236_p9, %p235_p8 }
  0x1d   : > { %p1146_p12 = scmp.ge.s32.totalorder %s1497_s20, 1  ;;  %p269_p13 = scmp.lt.s32.totalorder %s1497_s20, 3 }
  0x1e   : > { %s1863_s28 = scalar_select %p1610_p11, 1, 0 }
  0x1f   : > { %p1305_p0 = scmp.eq.s32.totalorder %s1589_s21, 0  ;;  %p1617_p1 = pnand %p1146_p12, %p269_p13 }
  0x20   : > { %s1500_s30 = smov [#allocation4]  }
  0x21   : > { %s287_s11 = sshll.u32 %s1500_s30, 4  ;;  %p1294_p2 = pneg %p1617_p1  ;;  %s288_s11 = int_to_ptr.vmem [resolvable:$true] %s287_s11 }
  0x22   : > { %s1386_s12 = scalar_lea.vmem %s288_s11, 512  ;;  %p1394_p8 = scmp.lt.s32.totalorder %s288_s11, %s288_s11 }
  0x23   : > { %p1295_p3 = pnand %p1305_p0, %p1294_p2  ;;  %p1387_p5 = scmp.ne.s32.totalorder %s288_s11, %s1386_s12 }
  0x24   : > { %p1395_p9 = scmp.lt.s32.totalorder %s1386_s12, %s1386_s12 }
  0x25   : > { %p1377_p4 = pneg %p1295_p3 }
  0x26   : > { %p1396_p11 = por %p1395_p9, %p1394_p8 }
  0x27   : > { %p1389_p6 = pnand %p1387_p5, %p1377_p4 }
  0x29   : > { %p1390_p7 = pneg %p1389_p6 }
  0x2b   : > { %p1397_p12 = pnand %p1396_p11, %p1390_p7 }
  0x2d   : > { %1400 = shalt.err (!%p1397_p12)
}
  0x2e   : > { %s1501_s13 = smov 128   ;;  %s1502_s14 = smov 8  }
  0x2f   : > { %1297 = dma.hbm_to_vmem [thread:$0]  (!%p1295_p3), %s1854_s5, 512, %s288_s11, [#allocation5], %s1501_s13, %s1501_s13, %s1502_s14  }
  0x30   : > { %326 = sbr.rel (%p1617_p1) target bundleno = 1822 (0x71e), region = 52 }
  0x35   : > { %1472 = dma.done.wait (%p1305_p0), [#allocation5], 512  }
  0x36   : > { %1474 = vsyncadd (%p1305_p0), [#allocation5], 4294966784  ;;  %p369_p13 = scmp.lt.s32.totalorder %s1589_s21, 1  ;;  %v1503_v0 = vmov 0.0   ;;  %vm1504_vm0 = vmmov 0   ;;  %v387_v1 = vld [vmem:[%s1852_s3 + $0x38] sm:$0xff]  ;;  %v560_v30 = vlaneseq }
  0x37   : > { %1209 = vmatprep.subr.mxu0 %v1503_v0  ;;  %1225 = vmatprep.mubr.msk.f32.mxu0 %vm1504_vm0, %v1503_v0  ;;  %v467_v2 = vld [vmem:[#allocation4 + $0x18] sm:$0xff]  ;;  %v386_v3 = vld [vmem:[%s1852_s3 + $0x30] sm:$0xff]  ;;  %v385_v5 = vld [vmem:[%s1852_s3 + $0x28] sm:$0xff]  ;;  %s1865_s2 = sld [smem:[#allocation15_spill]]  ;;  %vm475_vm1 = vcmask 261120   ;;  %vm389_vm2 = vcmask 523264  }
  0x38   : > { %s1639_s17 = scalar_select %p369_p13, %s1589_s21, 1  ;;  %1210 = vmatpush3.msra.mxu0 %v387_v1  ;;  %1228 = vmatprep.subr.mxu1 %v467_v2  ;;  %v466_v4 = vld [vmem:[#allocation4 + $0x10] sm:$0xff]  ;;  %v465_v6 = vld [vmem:[#allocation4 + $0x8] sm:$0xff]  ;;  %v384_v7 = vld [vmem:[%s1852_s3 + $0x20] sm:$0xff]  ;;  %v561_v31 = vand.u32 127, %v560_v30  ;;  %vm645_vm4 = vcmask 122880  }
  0x39   : > { %1211 = vmatprep.subr.mxu0 %v1503_v0  ;;  %1229 = vmatpush3.msra.mxu1 %v467_v2  ;;  %v464_v8 = vld [vmem:[#allocation4] sm:$0xff]  ;;  %v383_v10 = vld [vmem:[%s1852_s3 + $0x18] sm:$0xff]  ;;  %v382_v12 = vld [vmem:[%s1852_s3 + $0x10] sm:$0xff]  ;;  %s1866_s1 = sld [smem:[#allocation14_spill]]  ;;  %s1506_s11 = smov 96   ;;  %vm663_vm5 = vcmask 130048  }
  0x3a   : > { %s1172_s30 = sshll.u32 %s1639_s17, 4  ;;  %1212 = vmatpush3.msra.mxu0 %v386_v3  ;;  %1230 = vmatprep.subr.mxu1 %v466_v4  ;;  %v381_v13 = vld [vmem:[%s1852_s3 + $0x8] sm:$0xff]  ;;  %v380_v14 = vld [vmem:[%s1852_s3] sm:$0xff]  ;;  %s559_s12 = sld [smem:[#allocation3 + %s1589_s21]]  ;;  %vm913_vm6 = vcmask 1040384   ;;  %vm915_vm7 = vcmask 123904  }
  0x3b   : > { %1213 = vmatprep.subr.mxu0 %v1503_v0  ;;  %1231 = vmatpush3.msra.mxu1 %v466_v4  ;;  %v1155_v16 = vld [vmem:[%s1855_s6] ss:$0 sm:$0xff]  ;;  %s1507_s13 = smov 32   ;;  %s1745_s14 = sand.u32 1, %s1489_s0  }
  0x3c   : > { %1214 = vmatpush3.msra.mxu0 %v385_v5  ;;  %1232 = vmatprep.subr.mxu1 %v465_v6  ;;  %v388_v21 = vld [vmem:[%s1853_s4] sm:$0x1]  ;;  %s1007_s25 = scalar_lea.sflag [#allocation6], %s1745_s14 }
  0x3d   : > { %s376_s15 = scalar_lea.vmem %s1865_s2, %s1172_s30  ;;  %1215 = vmatprep.subr.mxu0 %v1503_v0  ;;  %1233 = vmatpush3.msra.mxu1 %v465_v6  ;;  %s1505_s30 = smov 64   ;;  %v929_v6 = vld [vmem:[%s1856_s7 + $0x38] sm:$0xff] }
  0x3e   : > { %v378_v9 = vld [vmem:[%s376_s15] sm:$0xff]  ;;  %1216 = vmatpush3.msra.mxu0 %v384_v7  ;;  %1234 = vmatprep.subr.mxu1 %v464_v8  ;;  %v379_v11 = vld [vmem:[%s376_s15 + $0x8] sm:$0xff]  ;;  %v928_v7 = vld [vmem:[%s1856_s7 + $0x30] sm:$0xff] }
  0x3f   : > { %1217 = vmatprep.subr.mxu0 %v1503_v0  ;;  %1235 = vmatpush3.msra.mxu1 %v464_v8  ;;  %s371_s15 = scalar_lea.vmem %s1866_s1, %s1639_s17  ;;  %v927_v8 = vld [vmem:[%s1856_s7 + $0x28] sm:$0xff] }
  0x40   : > { %1236 = vmatprep.mubr.msk.f32.mxu1 %vm475_vm1, %v378_v9  ;;  %1218 = vmatpush3.msra.mxu0 %v383_v10  ;;  %v377_v15 = vld [vmem:[%s371_s15] sm:$0x1]  ;;  %v562_v32 = vstv %s559_s12  ;;  %s1151_s15 = sshll.u32 %s1745_s14, 1  ;;  %v925_v10 = vld [vmem:[%s1856_s7 + $0x18] sm:$0xff]  ;;  %s1168_s12 = sshll.u32 %s1589_s21, 5 }
  0x41   : > { %1237 = vmatmul.mubr.msk.f32.vlgmr.msra.gmra.mxu1 %vm475_vm1, %v379_v11  ;;  %1219 = vmatprep.subr.mxu0 %v1503_v0  ;;  %vm1714_vm3 = vcmp.lt.s32.totalorder %v561_v31, %v562_v32  ;;  %s1749_s16 = scalar_lea.vmem [#allocation7], %s1151_s15  ;;  %v926_v9 = vld [vmem:[%s1856_s7 + $0x20] sm:$0xff]  ;;  %v924_v11 = vld [vmem:[%s1856_s7 + $0x10] sm:$0xff]  ;;  %s1022_s17 = scalar_lea.hbm %s1858_s9, %s1168_s12 }
  0x42   : > { %1220 = vmatpush3.msra.mxu0 %v382_v12  ;;  %1239 = vmatprep.subr.mxu1 %v1503_v0  ;;  %v923_v12 = vld [vmem:[%s1856_s7 + $0x8] sm:$0xff]  ;;  %s1024_s24 = sshll.u32 %s1749_s16, 4  ;;  %s1025_s24 = int_to_ptr.vmem [resolvable:$true] %s1024_s24 }
  0x43   : > { %1221 = vmatprep.subr.mxu0 %v1503_v0  ;;  %1243 = vmatprep.mubr.msk.f32.mxu1 %vm1504_vm0, %v1503_v0  ;;  %s1401_s29 = scalar_lea.vmem %s1025_s24, 32 }
  0x44   : > { %1222 = vmatpush3.msra.mxu0 %v381_v13  ;;  %v922_v13 = vld [vmem:[%s1856_s7] sm:$0xff]  ;;  %p1402_p11 = scmp.ne.s32.totalorder %s1025_s24, %s1401_s29 }
  0x45   : > { %1223 = vmatprep.subr.mxu0 %v1503_v0 }
  0x46   : > { %1224 = vmatpush3.msra.mxu0 %v380_v14  ;;  %p1403_p0 = pnand %p1402_p11, %p1606_p10 }
  0x47   : > { %1226 = vmatmul.mubr.msk.f32.vlgmr.msra.gmra.mxu0 %vm389_vm2, %v377_v15  ;;  %1267 = vmatprep.subr.mxu0 %v1503_v0 }
  0x48   : > { %1283 = vmatprep.mubr.msk.f32.mxu0 %vm1504_vm0, %v1503_v0  ;;  %1268 = vmatpush3.msra.mxu0 %v929_v6  ;;  %p1404_p1 = pneg %p1403_p0 }
  0x49   : > { %1269 = vmatprep.subr.mxu0 %v1503_v0 }
  0x4a   : > { %1270 = vmatpush3.msra.mxu0 %v928_v7 }
  0x4b   : > { %1271 = vmatprep.subr.mxu0 %v1503_v0 }
  0x4c   : > { %1272 = vmatpush3.msra.mxu0 %v927_v8 }
  0x4d   : > { %1273 = vmatprep.subr.mxu0 %v1503_v0 }
  0x4e   : > { %1274 = vmatpush3.msra.mxu0 %v926_v9 }
  0x4f   : > { %1275 = vmatprep.subr.mxu0 %v1503_v0 }
  0x50   : > { %1276 = vmatpush3.msra.mxu0 %v925_v10 }
  0x51   : > { %1277 = vmatprep.subr.mxu0 %v1503_v0 }
  0x52   : > { %1278 = vmatpush3.msra.mxu0 %v924_v11 }
  0x53   : > { %1279 = vmatprep.subr.mxu0 %v1503_v0 }
  0x54   : > { %1280 = vmatpush3.msra.mxu0 %v923_v12 }
  0x55   : > { %1281 = vmatprep.subr.mxu0 %v1503_v0 }
  0x56   : > { %1282 = vmatpush3.msra.mxu0 %v922_v13 }
 0x101   : > { %v1238_v17 = vpop.f32.mrf.mxu1 }
 0x102   : > { %v554_v18 = vadd.f32 %v1238_v17, %v1155_v16 }
 0x103   : > { %v548_v19 = vpop.f32.mrf.mxu1 }
 0x104   : > { %1349 = vtanh.f32 %v554_v18  ;;  %v549_v20 = vadd.f32 %v1155_v16, %v548_v19 }
 0x106   : > { %1351 = vtanh.f32 %v549_v20 }
 0x107   : > { %v459_v22 = vpop.f32.mrf.mxu0 }
 0x108   : > { %v460_v23 = vadd.f32 %v459_v22, %v388_v21 }
 0x109   : > { %v1227_v24 = vpop.f32.mrf.mxu0 }
 0x10a   : > { %1353 = vtanh.f32 %v460_v23 }
 0x111   : > { %v1695_v25 = vpop.eup %1349 }
 0x112   : > { %659 = vrot.lane.b32.xlu1 %v1695_v25, %s1505_s30  ;;  %1240 = vmatpush3.xpose.msk.msra.mxu1 %vm475_vm1, %v1695_v25 }
 0x113   : > { %1241 = vmatprep.subr.mxu1 %v1503_v0  ;;  %v1701_v26 = vpop.eup %1351 }
 0x116   : > { %657 = vrot.lane.b32.xlu1 %v1701_v26, %s1505_s30  ;;  %1242 = vmatpush3.xpose.msk.msra.mxu1 %vm475_vm1, %v1701_v26 }
 0x117   : > { %v1354_v27 = vpop.eup %1353  ;;  %1246 = vmatprep.subr.mxu1 %v1503_v0 }
 0x119   : > { %1244 = vmatmul.mubr.msk.f32.vlgmr.msra.gmra.mxu1 %vm475_vm1, %v1354_v27 }
 0x11a   : > { %739 = vrot.lane.b32.xlu1 %v1701_v26, %s1506_s11  ;;  %1250 = vmatprep.mubr.msk.f32.mxu1 %vm1504_vm0, %v1503_v0 }
 0x11e   : > { %737 = vrot.lane.b32.xlu1 %v1354_v27, %s1506_s11 }
 0x184   : > { %v660_v28 = vpop.permute.xlu1 %659 }
 0x185   : > { %1247 = vmatpush3.msra.mxu1 %v660_v28 }
 0x186   : > { %1248 = vmatprep.subr.mxu1 %v1503_v0 }
 0x188   : > { %v658_v29 = vpop.permute.xlu1 %657 }
 0x189   : > { %1249 = vmatpush3.msra.mxu1 %v658_v29 }
 0x18a   : > { %1253 = vmatprep.subr.mxu1 %v1503_v0 }
 0x18c   : > { %v740_v48 = vpop.permute.xlu1 %739 }
 0x190   : > { %v738_v49 = vpop.permute.xlu1 %737 }
 0x1d9   : > { %v639_v33 = vpop.f32.mrf.mxu1 }
 0x1da   : > { %v643_v35 = vmul.f32 2.0, %v639_v33 }
 0x1db   : > { %v1245_v36 = vpop.f32.mrf.mxu1 }
 0x1dc   : > { %v644_v37 = vsel %vm1714_vm3, %v643_v35, -1e+30 }
 0x1dd   : > { %v646_v38 = vsel %vm645_vm4, %v644_v37, -inf }
 0x1de   : > { %647 = vmax.xlane.f32.xlu0 %v646_v38 }
 0x267   : > { %v648_v39 = vpop.xlane.xlu0 %647 }
 0x268   : > { %v649_v40 = vsub.f32 %v644_v37, %v648_v39 }
 0x26a   : > { %v650_v41 = vmul.f32 1.442695, %v649_v40 }
 0x26c   : > { %1355 = vpow2.f32 %v650_v41 }
 0x279   : > { %v1356_v42 = vpop.eup %1355 }
 0x27a   : > { %v652_v43 = vsel %vm645_vm4, %v1356_v42, 0.0 }
 0x27b   : > { %653 = vadd.xlane.f32.xlu0 %v652_v43 }
 0x291   : > { %741 = vrot.lane.b32.xlu0 %v1695_v25, %s1506_s11 }
 0x304   : > { %v654_v44 = vpop.xlane.xlu0 %653 }
 0x305   : > { %1357 = vrcp.f32 %v654_v44 }
 0x308   : > { %v742_v47 = vpop.permute.xlu0 %741 }
 0x312   : > { %v1358_v45 = vpop.eup %1357 }
 0x313   : > { %v656_v46 = vmul.f32 %v1358_v45, %v1356_v42 }
 0x315   : > { %1251 = vmatmul.mubr.msk.f32.vlgmr.msra.gmra.mxu1 %vm663_vm5, %v656_v46 }
 0x316   : > { %1254 = vmatpush3.xpose.msk.msra.mxu1 %vm475_vm1, %v742_v47  ;;  %1257 = vmatprep.mubr.msk.f32.mxu1 %vm1504_vm0, %v1503_v0 }
 0x317   : > { %1255 = vmatprep.subr.mxu1 %v1503_v0 }
 0x31a   : > { %1256 = vmatpush3.xpose.msk.msra.mxu1 %vm475_vm1, %v740_v48 }
 0x31b   : > { %1260 = vmatprep.subr.mxu1 %v1503_v0 }
 0x31d   : > { %1258 = vmatmul.mubr.msk.f32.vlgmr.msra.gmra.mxu1 %vm475_vm1, %v738_v49 }
 0x31e   : > { %1264 = vmatprep.mubr.msk.f32.mxu1 %vm1504_vm0, %v1503_v0 }
 0x3d5   : > { %v1733_v50 = vpop.f32.mrf.mxu1 }
 0x3d7   : > { %v1252_v51 = vpop.f32.mrf.mxu1 }
 0x3dd   : > { %v815_v52 = vpop.f32.mrf.mxu1 }
 0x3de   : > { %v819_v53 = vmul.f32 2.0, %v815_v52 }
 0x3df   : > { %v1259_v54 = vpop.f32.mrf.mxu1 }
 0x3e0   : > { %v820_v55 = vsel %vm1714_vm3, %v819_v53, -1e+30 }
 0x3e1   : > { %v821_v56 = vsel %vm645_vm4, %v820_v55, -inf }
 0x3e2   : > { %822 = vmax.xlane.f32.xlu1 %v821_v56 }
 0x3f3   : > { %834 = vrot.lane.b32.xlu1 %v1695_v25, %s1507_s13 }
 0x46b   : > { %v823_v57 = vpop.xlane.xlu1 %822 }
 0x46c   : > { %v824_v58 = vsub.f32 %v820_v55, %v823_v57 }
 0x46e   : > { %v825_v59 = vmul.f32 1.442695, %v824_v58 }
 0x46f   : > { %v835_v60 = vpop.permute.xlu1 %834 }
 0x470   : > { %1359 = vpow2.f32 %v825_v59  ;;  %1261 = vmatpush3.msra.mxu1 %v835_v60 }
 0x471   : > { %1262 = vmatprep.subr.mxu1 %v1503_v0 }
 0x47d   : > { %v1360_v61 = vpop.eup %1359 }
 0x47e   : > { %v827_v62 = vsel %vm645_vm4, %v1360_v61, 0.0 }
 0x47f   : > { %828 = vadd.xlane.f32.xlu0 %v827_v62 }
 0x495   : > { %832 = vrot.lane.b32.xlu0 %v1701_v26, %s1507_s13 }
 0x508   : > { %v829_v63 = vpop.xlane.xlu0 %828 }
 0x509   : > { %1361 = vrcp.f32 %v829_v63 }
 0x50c   : > { %v833_v1 = vpop.permute.xlu0 %832 }
 0x50d   : > { %1263 = vmatpush3.msra.mxu1 %v833_v1 }
 0x516   : > { %v1362_v2 = vpop.eup %1361 }
 0x517   : > { %v831_v3 = vmul.f32 %v1362_v2, %v1360_v61 }
 0x519   : > { %1265 = vmatmul.mubr.msk.f32.vlgmr.msra.gmra.mxu1 %vm663_vm5, %v831_v3  ;;  %v911_v4 = vrot.slane %v831_v3, 7 }
 0x51b   : > { %v914_v5 = vsel %vm913_vm6, %v656_v46, %v911_v4 }
 0x51c   : > { %916 = vst.msk [vmem:[%s1749_s16] sm:$0x3] %vm915_vm7, %v914_v5 }
 0x5d9   : > { %v907_v14 = vpop.f32.mrf.mxu1 }
 0x5da   : > { %918 = vrot.lane.b32.xlu1 %v907_v14, %s1507_s13  ;;  %s1508_s13 = smov [#allocation7]  }
 0x5db   : > { %v1266_v15 = vpop.f32.mrf.mxu1  ;;  %s1405_s30 = sshll.u32 %s1508_s13, 4  ;;  %s1406_s30 = int_to_ptr.vmem [resolvable:$false] %s1405_s30 }
 0x5dc   : > { %s1407_s11 = scalar_lea.vmem %s1406_s30, 64  ;;  %p1408_p2 = scmp.lt.s32.totalorder %s1025_s24, %s1406_s30 }
 0x5dd   : > { %p1409_p3 = scmp.lt.s32.totalorder %s1407_s11, %s1401_s29 }
 0x5df   : > { %p1410_p4 = por %p1409_p3, %p1408_p2 }
 0x5e1   : > { %p1411_p5 = pnand %p1410_p4, %p1404_p1 }
 0x64c   : > { %v919_v16 = vpop.permute.xlu1 %918 }
 0x64d   : > { %v921_v17 = vsel %vm475_vm1, %v1733_v50, %v919_v16 }
 0x64e   : > { %1284 = vmatmul.mubr.msk.f32.vlgmr.msra.gmra.mxu0 %vm389_vm2, %v921_v17 }
 0x64f   : > { %1414 = shalt.err (!%p1411_p5)
}
 0x650   : > { %s1415_s1 = scalar_lea.hbm %s1022_s17, 32  ;;  %s1419_s15 = scalar_lea.hbm %s1858_s9, 64 }
 0x651   : > { %p1416_p6 = scmp.ne.s32.totalorder %s1022_s17, %s1415_s1  ;;  %p1420_p9 = scmp.lt.s32.totalorder %s1022_s17, %s1858_s9 }
 0x652   : > { %p1421_p12 = scmp.lt.s32.totalorder %s1419_s15, %s1415_s1 }
 0x653   : > { %p1417_p7 = pnand %p1416_p6, %p1606_p10 }
 0x654   : > { %p1422_p13 = por %p1421_p12, %p1420_p9 }
 0x655   : > { %p1418_p8 = pneg %p1417_p7 }
 0x657   : > { %p1423_p11 = pnand %p1422_p13, %p1418_p8 }
 0x659   : > { %1426 = shalt.err (!%p1423_p11)
}
 0x65a   : > { %1290 = dma.vmem_to_hbm [thread:$0]  (%p1606_p10), %s1025_s24, 32, %s1022_s17, %s1007_s25   ;;  %v930_v0 = vld [vmem:[%s1857_s8] sm:$0x1]  ;;  %vm1004_vm8 = vcmask 253952  }
 0x65b   : > { %s1169_s30 = sshll.u32 %s1589_s21, 4  ;;  %s368_s11 = scalar_lea.vmem [#allocation8], %s1745_s14 }
 0x65c   : > { %s1037_s16 = sshll.u32 %s368_s11, 4  ;;  %s1813_s12 = scalar_lea.hbm %s1859_s10, %s1169_s30  ;;  %s1038_s16 = int_to_ptr.vmem [resolvable:$true] %s1037_s16 }
 0x65d   : > { %s1012_s15 = scalar_lea.sflag [#allocation9], %s1745_s14  ;;  %s1427_s17 = scalar_lea.vmem %s1038_s16, 16 }
 0x65e   : > { %p1428_p0 = scmp.ne.s32.totalorder %s1038_s16, %s1427_s17  ;;  %s1509_s21 = smov [#allocation8]  }
 0x65f   : > { %s1431_s24 = sshll.u32 %s1509_s21, 4  ;;  %s1432_s24 = int_to_ptr.vmem [resolvable:$false] %s1431_s24 }
 0x660   : > { %p1429_p1 = pnand %p1428_p0, %p1606_p10  ;;  %s1433_s25 = scalar_lea.vmem %s1432_s24, 32 }
 0x661   : > { %p1434_p3 = scmp.lt.s32.totalorder %s1038_s16, %s1432_s24  ;;  %p1435_p4 = scmp.lt.s32.totalorder %s1433_s25, %s1427_s17 }
 0x662   : > { %p1430_p2 = pneg %p1429_p1 }
 0x663   : > { %p1436_p5 = por %p1435_p4, %p1434_p3 }
 0x665   : > { %p1437_p6 = pnand %p1436_p5, %p1430_p2 }
 0x70e   : > { %v1000_v18 = vpop.f32.mrf.mxu0 }
 0x70f   : > { %v1001_v19 = vadd.f32 %v1000_v18, %v930_v0 }
 0x710   : > { %v1285_v20 = vpop.f32.mrf.mxu0 }
 0x711   : > { %1005 = vst.msk [vmem:[%s368_s11] sm:$0x1] %vm1004_vm8, %v1001_v19 }
 0x712   : > { %1440 = shalt.err (!%p1437_p6)
}
 0x713   : > { %s1441_s22 = scalar_lea.hbm %s1813_s12, 16  ;;  %s1445_s13 = scalar_lea.hbm %s1859_s10, 32 }
 0x714   : > { %p1442_p7 = scmp.ne.s32.totalorder %s1813_s12, %s1441_s22  ;;  %p1446_p12 = scmp.lt.s32.totalorder %s1813_s12, %s1859_s10 }
 0x715   : > { %p1447_p13 = scmp.lt.s32.totalorder %s1445_s13, %s1441_s22 }
 0x716   : > { %p1443_p8 = pnand %p1442_p7, %p1606_p10 }
 0x717   : > { %p1448_p11 = por %p1447_p13, %p1446_p12 }
 0x718   : > { %p1444_p9 = pneg %p1443_p8 }
 0x71a   : > { %p1449_p0 = pnand %p1448_p11, %p1444_p9 }
 0x71c   : > { %1452 = shalt.err (!%p1449_p0)
}
 0x71d   : > { %1291 = dma.vmem_to_hbm [thread:$0]  (%p1606_p10), %s1038_s16, 16, %s1813_s12, %s1012_s15  }
 0x71e PF: > { %p1307_p1 = scmp.ge.s32.totalorder %s1497_s20, 2  ;;  %s1049_s1 = sand.u32 1, %s1485_s18  }
 0x71f   : > { %p1869_p2 = scmp.ne.s32.totalorder %s1863_s28, 0  ;;  %s1050_s2 = scalar_lea.sflag [#allocation6], %s1049_s1 }
 0x721   : > { %p1299_p3 = pnand %p1307_p1, %p1869_p2 }
 0x723   : > { %p1300_p4 = pneg %p1299_p3 }
 0x725   : > { %1476 = dma.done.wait (%p1300_p4), %s1050_s2, 32  }
 0x726   : > { %1478 = vsyncadd (%p1300_p4), %s1050_s2, 4294967264  ;;  %s1059_s17 = scalar_lea.sflag [#allocation9], %s1049_s1 }
 0x727   : > { %1480 = dma.done.wait (%p1300_p4), %s1059_s17, 16  }
 0x728   : > { %1482 = vsyncadd (%p1300_p4), %s1059_s17, 4294967280  ;;  %p31_p10 = scmp.ge.s32.totalorder %s1593_s23, 4   ;;  %s1870_s18 = smov %s1489_s0 }
 0x729   : > { %s1871_s0 = smov %s1493_s19  ;;  %s1872_s19 = smov %s1604_s26 }
 0x72a   : > { %s1873_s20 = smov %s1593_s23  ;;  %33 = sbr.rel (!%p31_p10) target bundleno = 22 (0x16), region = 112 }
 0x72f   :  { %1063 = vsyncpa [#allocation5], 1 }
 0x730   :  { %1065 = vsyncpa [#allocation5 + $0x1], 1 }
 0x731   :  { %1066 = vsyncpa [#allocation6], 1 }
 0x732   :  { %1068 = vsyncpa [#allocation6 + $0x1], 1 }
 0x733   :  { %1069 = vsyncpa [#allocation9], 1 }
 0x734   :  { %1071 = vsyncpa [#allocation9 + $0x1], 1 }

</bundles_post_ra>
